<compile_context>
chip_gen: v5e
topology: v5e:2x2
jax: 0.10.0
libtpu: 0.0.40
codegen_flags: <defaults>
</compile_context>

<pallas_src>
import functools

import jax
import jax.numpy as jnp
import numpy as np
from jax import lax
from jax.experimental import pallas as pl
from jax.experimental.pallas import tpu as pltpu


# Packed parameter layout (f32[32] in SMEM):
#   [0:8]   w1 (4x2 row-major)  direction_att Linear(2,4) weight
#   [8:12]  b1                  direction_att Linear(2,4) bias
#   [12:16] w2                  direction_att Linear(4,1) weight
#   [16]    b2                  direction_att Linear(4,1) bias
#   [17:27] wf                  feat_proj Linear(10,1) weight (first 5 = node j, last 5 = node i)
#   [27]    bf                  feat_proj bias
#   [28]    wv                  vel_proj Linear(1,1) weight
#   [29]    bv                  vel_proj bias
#   [30:32] padding


def _fast_recip(v):
    """EUP approximate reciprocal + one Newton step (~f32 accuracy).

    Moves the divide off the VALU (the binding slot in this all-elementwise
    kernel) while staying well inside the float32 parity tolerances.
    """
    r = pl.reciprocal(v, approx=True)
    return r * (2.0 - v * r)


def _graph_attention_kernel(x_ref, p_ref, rg_ref, deg_ref):
    x = x_ref[...]                                # [Bt, N, F]
    _, n, _ = x.shape

    # Identity mask used to relayout per-node column vectors [Bt,N,1] into row
    # vectors [Bt,1,N]: multiply + sublane reduce (XLU). Avoids any transpose
    # op in-kernel and the pre-transposed X copy from the wrapper.
    eye = (lax.broadcasted_iota(jnp.int32, (n, n), 0) ==
           lax.broadcasted_iota(jnp.int32, (n, n), 1)).astype(jnp.float32)

    def to_row(col):                              # [Bt,N,1] -> [Bt,1,N]
        return jnp.sum(col * eye[None, :, :], axis=1, keepdims=True)

    # ---- direction attention -------------------------------------------------
    # con_dir[j,i,:] = [dir[j], dir[i]]; Linear(2,4) -> ReLU -> Softmax(-1) -> Linear(4,1)
    dir_j = x[:, :, 8:9]                          # [Bt,N,1]
    dir_i = to_row(dir_j)                         # [Bt,1,N]
    hs = [jnp.maximum(dir_j * p_ref[2 * k] + dir_i * p_ref[2 * k + 1] + p_ref[8 + k], 0.0)
          for k in range(4)]                      # [Bt,N,N] each
    hmax = jnp.maximum(jnp.maximum(hs[0], hs[1]), jnp.maximum(hs[2], hs[3]))
    es = [jnp.exp(h - hmax) for h in hs]
    num = es[0] * p_ref[12] + es[1] * p_ref[13] + es[2] * p_ref[14] + es[3] * p_ref[15]
    den = es[0] + es[1] + es[2] + es[3]
    dir_scores = p_ref[16] + num * _fast_recip(den)       # inv_den factored out of the k-loop

    # ---- feature projection ----------------------------------------------------
    # feat = X[:, [0,5,6,7,9]]; score[j,i] = feat[j]@wf[:5] + feat[i]@wf[5:] + bf
    feat_idx = (0, 5, 6, 7, 9)
    a_j = x[:, :, 0:1] * p_ref[17]                # node-j combo (seeded, no zeros init)
    b_col = x[:, :, 0:1] * p_ref[22]              # node-i combo (relayout once, after the sum)
    for c, col in enumerate(feat_idx[1:], start=1):
        a_j = a_j + x[:, :, col:col + 1] * p_ref[17 + c]
        b_col = b_col + x[:, :, col:col + 1] * p_ref[22 + c]
    feat_scores = (a_j + p_ref[27]) + to_row(b_col)       # [Bt,N,N]

    # ---- pairwise euclidean distances (position & velocity), VPU-only ----------
    def pairdist(cx, cy):
        dx = cx - to_row(cx)                      # [Bt,N,N]
        dy = cy - to_row(cy)
        d2 = dx * dx + dy * dy                    # exact squared distance (no gram cancellation)
        return d2, jnp.sqrt(d2 + 1e-8)

    d2_pos, dis = pairdist(x[:, :, 1:2], x[:, :, 2:3])
    _, veld = pairdist(x[:, :, 3:4], x[:, :, 4:5])
    vel_scores = veld * p_ref[28] + p_ref[29]

    # ---- relation graph ---------------------------------------------------------
    rel = (30.0 * _fast_recip(dis + 1e-4)) * dir_scores * feat_scores * vel_scores
    # dis > 30  <=>  d2 > 900 in f32 (the +1e-8 vanishes at this magnitude);
    # masking on d2 keeps the sqrt off the mask's critical path.
    rel = jnp.where(d2_pos > 900.0, -jnp.inf, rel)

    # softmax over the last axis (dim=2 of [B,N,N])
    m = jnp.max(rel, axis=-1, keepdims=True)
    e = jnp.exp(rel - m)
    s = jnp.sum(e, axis=-1, keepdims=True)
    rg = e * _fast_recip(s)
    rg_ref[...] = rg

    nz = jnp.sum(jnp.where(rg != 0.0, 1.0, 0.0), axis=-1, keepdims=True)
    deg_ref[...] = nz.astype(jnp.int32) - 1


def _pick_block_b(B):
    """Batch elements per grid step: amortize per-step overhead, but keep the
    grid length >= 2 when possible so v7x can split it across both TCs."""
    if B <= 2:
        return 1
    for bt in (64, 32, 16, 8, 4, 2):
        if B // bt >= 2:
            return bt
    return 1


@functools.partial(jax.jit, static_argnames=("block_b",))
def graph_attention_forward(x, params, block_b=None):
    B, N, F = x.shape
    w1, b1, w2, b2, wf, bf, wv, bv = params
    packed = jnp.concatenate([
        w1.reshape(-1), b1, w2, b2, wf, bf, wv, bv,
        jnp.zeros((2,), jnp.float32),
    ]).astype(jnp.float32)                                 # single f32[32] SMEM operand

    Bt = _pick_block_b(B) if block_b is None else block_b
    Bp = ((B + Bt - 1) // Bt) * Bt
    if Bp != B:                                            # pad batch to a Bt multiple (sliced off below)
        x = jnp.pad(x, ((0, Bp - B), (0, 0), (0, 0)))

    rg, deg = pl.pallas_call(
        _graph_attention_kernel,
        out_shape=(
            jax.ShapeDtypeStruct((Bp, N, N), jnp.float32),
            jax.ShapeDtypeStruct((Bp, N, 1), jnp.int32),
        ),
        grid=(Bp // Bt,),
        in_specs=[
            pl.BlockSpec((Bt, N, F), lambda b: (b, 0, 0)),
            pl.BlockSpec(memory_space=pltpu.MemorySpace.SMEM),
        ],
        out_specs=(
            pl.BlockSpec((Bt, N, N), lambda b: (b, 0, 0)),
            pl.BlockSpec((Bt, N, 1), lambda b: (b, 0, 0)),
        ),
        compiler_params=pltpu.CompilerParams(
            dimension_semantics=("parallel",)),            # batch axis is truly parallel
    )(x, packed)
    return deg[:B, :, 0], rg[:B]


def init_params(key):
    """Deterministic synthetic parameters (shapes follow the nn.Module __init__)."""
    ks = jax.random.split(key, 4)
    w1 = 0.3 * jax.random.normal(ks[0], (4, 2), jnp.float32)   # direction_att Linear(2,4)
    b1 = 0.1 * jax.random.normal(ks[1], (4,), jnp.float32)
    w2 = 0.3 * jax.random.normal(ks[2], (4,), jnp.float32)     # direction_att Linear(4,1)
    b2 = jnp.array([0.2], jnp.float32)
    wf = 0.05 * jax.random.normal(ks[3], (10,), jnp.float32)   # feat_proj Linear(10,1)
    bf = jnp.array([0.1], jnp.float32)
    wv = jnp.array([0.2], jnp.float32)                         # vel_proj Linear(1,1)
    bv = jnp.array([0.1], jnp.float32)
    return (w1, b1, w2, b2, wf, bf, wv, bv)


def reference_forward(x, params):
    """Pure-JAX mirror of the PyTorch forward (for a sanity check)."""
    w1, b1, w2, b2, wf, bf, wv, bv = params
    B, N, _ = x.shape
    dir_col = x[:, :, 8:9]
    feat_col = jnp.concatenate([x[:, :, 0:1], x[:, :, 5:8], x[:, :, 9:10]], axis=2)
    dir_m = jnp.concatenate([
        jnp.broadcast_to(dir_col[:, :, None, :], (B, N, N, 1)),
        jnp.broadcast_to(dir_col[:, None, :, :], (B, N, N, 1))], axis=-1)
    feat_m = jnp.concatenate([
        jnp.broadcast_to(feat_col[:, :, None, :], (B, N, N, 5)),
        jnp.broadcast_to(feat_col[:, None, :, :], (B, N, N, 5))], axis=-1)
    h = jnp.maximum(dir_m @ w1.T + b1, 0.0)
    sm = jax.nn.softmax(h, axis=-1)
    dir_scores = (sm @ w2[:, None])[..., 0] + b2[0]
    feat_scores = (feat_m @ wf[:, None])[..., 0] + bf[0]

    def pdist(P):
        r = jnp.sum(P * P, axis=2)[:, :, None]
        g = jnp.einsum('bnd,bmd->bnm', P, P)
        return jnp.sqrt(r - 2.0 * g + jnp.swapaxes(r, 1, 2) + 1e-8)

    dis = pdist(x[:, :, 1:3])
    vel_scores = pdist(x[:, :, 3:5]) * wv[0] + bv[0]
    rel = 30.0 / (dis + 1e-4) * dir_scores * feat_scores * vel_scores
    rel = jnp.where(dis > 30.0, -jnp.inf, rel)
    rel = jax.nn.softmax(rel, axis=2)
    deg = jnp.sum((rel != 0.0).astype(jnp.int32), axis=2) - 1
    return deg, rel


if __name__ == "__main__":
    key = jax.random.PRNGKey(0)
    kp, k1, k2 = jax.random.split(key, 3)
    params = init_params(kp)

    def make_inputs(k, B, N, F):
        kx, kpos, kvel = jax.random.split(k, 3)
        feats = jax.random.normal(kx, (B, N, F), jnp.float32)
        # integer-valued positions/velocities keep the pairwise-distance math
        # exact (distances up to ~44 m so the dis > 30 mask is exercised)
        pos = jax.random.randint(kpos, (B, N, 2), 0, 32).astype(jnp.float32)
        vel = jax.random.randint(kvel, (B, N, 2), 0, 8).astype(jnp.float32)
        return feats.at[:, :, 1:3].set(pos).at[:, :, 3:5].set(vel)

    # case 1: the small spec shape (batch=2, Max_node_num=16, feature_dim=10)
    # case 2: a larger, non-divisible batch to exercise batch-blocking + padding
    for (B, N, F), kk in (((2, 16, 10), k1), ((13, 16, 10), k2)):
        X = make_inputs(kk, B, N, F)
        deg, rg = graph_attention_forward(X, params)
        jax.block_until_ready((deg, rg))

        deg_ref, rg_ref = reference_forward(X, params)
        assert rg.shape == (B, N, N) and deg.shape == (B, N)
        assert np.allclose(np.asarray(rg), np.asarray(rg_ref), rtol=5e-3, atol=1e-5), \
            float(np.max(np.abs(np.asarray(rg) - np.asarray(rg_ref))))
        assert np.array_equal(np.asarray(deg), np.asarray(deg_ref))

    print("KERNEL_OK")
</pallas_src>

<mosaic_0001>
module attributes {stable_mosaic.version = 11 : i64} {
  func.func @_graph_attention_kernel(%arg0: i32, %arg1: memref<1x16x10xf32, #tpu.memory_space<vmem>>, %arg2: memref<32xf32, #tpu.memory_space<smem>>, %arg3: memref<1x16x16xf32, #tpu.memory_space<vmem>>, %arg4: memref<1x16x1xi32, #tpu.memory_space<vmem>>) attributes {dimension_semantics = [#tpu.dimension_semantics<parallel>], iteration_bounds = array<i64: 2>, scalar_prefetch = 0 : i64, scratch_operands = 0 : i64, tpu.core_type = #tpu.core_type<tc>, window_params = [{transform_indices = @transform_0, window_bounds = array<i64: 1, 16, 10>}, {transform_indices = @transform_1, window_bounds = array<i64: 32>}, {transform_indices = @transform_2, window_bounds = array<i64: 1, 16, 16>}, {transform_indices = @transform_3, window_bounds = array<i64: 1, 16, 1>}]} {
    %c0 = arith.constant 0 : index
    %c0_0 = arith.constant 0 : index
    %c0_1 = arith.constant 0 : index
    %0 = vector.load %arg1[%c0, %c0_0, %c0_1] : memref<1x16x10xf32, #tpu.memory_space<vmem>>, vector<1x16x10xf32>
    %1 = tpu.iota {dimensions = array<i32: 0>} : vector<16x16xi32>
    %2 = tpu.iota {dimensions = array<i32: 1>} : vector<16x16xi32>
    %3 = arith.cmpi eq, %1, %2 : vector<16x16xi32>
    %4 = arith.extui %3 : vector<16x16xi1> to vector<16x16xi32>
    %5 = arith.sitofp %4 : vector<16x16xi32> to vector<16x16xf32>
    %6 = vector.extract_strided_slice %0 {offsets = [0, 0, 8], sizes = [1, 16, 1], strides = [1, 1, 1]} : vector<1x16x10xf32> to vector<1x16x1xf32>
    %7 = vector.shape_cast %5 : vector<16x16xf32> to vector<1x16x16xf32>
    %8 = vector.broadcast %6 : vector<1x16x1xf32> to vector<1x16x16xf32>
    %9 = arith.mulf %8, %7 : vector<1x16x16xf32>
    %cst = arith.constant dense<0.000000e+00> : vector<1x16xf32>
    %10 = vector.multi_reduction <add>, %9, %cst [1] : vector<1x16x16xf32> to vector<1x16xf32>
    %11 = vector.shape_cast %10 : vector<1x16xf32> to vector<1x1x16xf32>
    %c0_2 = arith.constant 0 : index
    %12 = memref.load %arg2[%c0_2] : memref<32xf32, #tpu.memory_space<smem>>
    %13 = vector.broadcast %12 : f32 to vector<1x16x1xf32>
    %14 = arith.mulf %6, %13 : vector<1x16x1xf32>
    %c1 = arith.constant 1 : index
    %15 = memref.load %arg2[%c1] : memref<32xf32, #tpu.memory_space<smem>>
    %16 = vector.broadcast %15 : f32 to vector<1x1x16xf32>
    %17 = arith.mulf %11, %16 : vector<1x1x16xf32>
    %18 = vector.broadcast %14 : vector<1x16x1xf32> to vector<1x16x16xf32>
    %19 = vector.broadcast %17 : vector<1x1x16xf32> to vector<1x16x16xf32>
    %20 = arith.addf %18, %19 : vector<1x16x16xf32>
    %c8 = arith.constant 8 : index
    %21 = memref.load %arg2[%c8] : memref<32xf32, #tpu.memory_space<smem>>
    %22 = vector.broadcast %21 : f32 to vector<1x16x16xf32>
    %23 = arith.addf %20, %22 : vector<1x16x16xf32>
    %cst_3 = arith.constant 0.000000e+00 : f32
    %24 = vector.broadcast %cst_3 : f32 to vector<1x16x16xf32>
    %25 = arith.maximumf %23, %24 : vector<1x16x16xf32>
    %c2 = arith.constant 2 : index
    %26 = memref.load %arg2[%c2] : memref<32xf32, #tpu.memory_space<smem>>
    %27 = vector.broadcast %26 : f32 to vector<1x16x1xf32>
    %28 = arith.mulf %6, %27 : vector<1x16x1xf32>
    %c3 = arith.constant 3 : index
    %29 = memref.load %arg2[%c3] : memref<32xf32, #tpu.memory_space<smem>>
    %30 = vector.broadcast %29 : f32 to vector<1x1x16xf32>
    %31 = arith.mulf %11, %30 : vector<1x1x16xf32>
    %32 = vector.broadcast %28 : vector<1x16x1xf32> to vector<1x16x16xf32>
    %33 = vector.broadcast %31 : vector<1x1x16xf32> to vector<1x16x16xf32>
    %34 = arith.addf %32, %33 : vector<1x16x16xf32>
    %c9 = arith.constant 9 : index
    %35 = memref.load %arg2[%c9] : memref<32xf32, #tpu.memory_space<smem>>
    %36 = vector.broadcast %35 : f32 to vector<1x16x16xf32>
    %37 = arith.addf %34, %36 : vector<1x16x16xf32>
    %cst_4 = arith.constant 0.000000e+00 : f32
    %38 = vector.broadcast %cst_4 : f32 to vector<1x16x16xf32>
    %39 = arith.maximumf %37, %38 : vector<1x16x16xf32>
    %c4 = arith.constant 4 : index
    %40 = memref.load %arg2[%c4] : memref<32xf32, #tpu.memory_space<smem>>
    %41 = vector.broadcast %40 : f32 to vector<1x16x1xf32>
    %42 = arith.mulf %6, %41 : vector<1x16x1xf32>
    %c5 = arith.constant 5 : index
    %43 = memref.load %arg2[%c5] : memref<32xf32, #tpu.memory_space<smem>>
    %44 = vector.broadcast %43 : f32 to vector<1x1x16xf32>
    %45 = arith.mulf %11, %44 : vector<1x1x16xf32>
    %46 = vector.broadcast %42 : vector<1x16x1xf32> to vector<1x16x16xf32>
    %47 = vector.broadcast %45 : vector<1x1x16xf32> to vector<1x16x16xf32>
    %48 = arith.addf %46, %47 : vector<1x16x16xf32>
    %c10 = arith.constant 10 : index
    %49 = memref.load %arg2[%c10] : memref<32xf32, #tpu.memory_space<smem>>
    %50 = vector.broadcast %49 : f32 to vector<1x16x16xf32>
    %51 = arith.addf %48, %50 : vector<1x16x16xf32>
    %cst_5 = arith.constant 0.000000e+00 : f32
    %52 = vector.broadcast %cst_5 : f32 to vector<1x16x16xf32>
    %53 = arith.maximumf %51, %52 : vector<1x16x16xf32>
    %c6 = arith.constant 6 : index
    %54 = memref.load %arg2[%c6] : memref<32xf32, #tpu.memory_space<smem>>
    %55 = vector.broadcast %54 : f32 to vector<1x16x1xf32>
    %56 = arith.mulf %6, %55 : vector<1x16x1xf32>
    %c7 = arith.constant 7 : index
    %57 = memref.load %arg2[%c7] : memref<32xf32, #tpu.memory_space<smem>>
    %58 = vector.broadcast %57 : f32 to vector<1x1x16xf32>
    %59 = arith.mulf %11, %58 : vector<1x1x16xf32>
    %60 = vector.broadcast %56 : vector<1x16x1xf32> to vector<1x16x16xf32>
    %61 = vector.broadcast %59 : vector<1x1x16xf32> to vector<1x16x16xf32>
    %62 = arith.addf %60, %61 : vector<1x16x16xf32>
    %c11 = arith.constant 11 : index
    %63 = memref.load %arg2[%c11] : memref<32xf32, #tpu.memory_space<smem>>
    %64 = vector.broadcast %63 : f32 to vector<1x16x16xf32>
    %65 = arith.addf %62, %64 : vector<1x16x16xf32>
    %cst_6 = arith.constant 0.000000e+00 : f32
    %66 = vector.broadcast %cst_6 : f32 to vector<1x16x16xf32>
    %67 = arith.maximumf %65, %66 : vector<1x16x16xf32>
    %68 = arith.maximumf %25, %39 : vector<1x16x16xf32>
    %69 = arith.maximumf %53, %67 : vector<1x16x16xf32>
    %70 = arith.maximumf %68, %69 : vector<1x16x16xf32>
    %71 = arith.subf %25, %70 : vector<1x16x16xf32>
    %72 = math.exp %71 : vector<1x16x16xf32>
    %73 = arith.subf %39, %70 : vector<1x16x16xf32>
    %74 = math.exp %73 : vector<1x16x16xf32>
    %75 = arith.subf %53, %70 : vector<1x16x16xf32>
    %76 = math.exp %75 : vector<1x16x16xf32>
    %77 = arith.subf %67, %70 : vector<1x16x16xf32>
    %78 = math.exp %77 : vector<1x16x16xf32>
    %c12 = arith.constant 12 : index
    %79 = memref.load %arg2[%c12] : memref<32xf32, #tpu.memory_space<smem>>
    %80 = vector.broadcast %79 : f32 to vector<1x16x16xf32>
    %81 = arith.mulf %72, %80 : vector<1x16x16xf32>
    %c13 = arith.constant 13 : index
    %82 = memref.load %arg2[%c13] : memref<32xf32, #tpu.memory_space<smem>>
    %83 = vector.broadcast %82 : f32 to vector<1x16x16xf32>
    %84 = arith.mulf %74, %83 : vector<1x16x16xf32>
    %85 = arith.addf %81, %84 : vector<1x16x16xf32>
    %c14 = arith.constant 14 : index
    %86 = memref.load %arg2[%c14] : memref<32xf32, #tpu.memory_space<smem>>
    %87 = vector.broadcast %86 : f32 to vector<1x16x16xf32>
    %88 = arith.mulf %76, %87 : vector<1x16x16xf32>
    %89 = arith.addf %85, %88 : vector<1x16x16xf32>
    %c15 = arith.constant 15 : index
    %90 = memref.load %arg2[%c15] : memref<32xf32, #tpu.memory_space<smem>>
    %91 = vector.broadcast %90 : f32 to vector<1x16x16xf32>
    %92 = arith.mulf %78, %91 : vector<1x16x16xf32>
    %93 = arith.addf %89, %92 : vector<1x16x16xf32>
    %94 = arith.addf %72, %74 : vector<1x16x16xf32>
    %95 = arith.addf %94, %76 : vector<1x16x16xf32>
    %96 = arith.addf %95, %78 : vector<1x16x16xf32>
    %c16 = arith.constant 16 : index
    %97 = memref.load %arg2[%c16] : memref<32xf32, #tpu.memory_space<smem>>
    %98 = tpu.reciprocal %96 {approx = true} : vector<1x16x16xf32> -> vector<1x16x16xf32>
    %99 = arith.mulf %96, %98 : vector<1x16x16xf32>
    %cst_7 = arith.constant 2.000000e+00 : f32
    %100 = vector.broadcast %cst_7 : f32 to vector<1x16x16xf32>
    %101 = arith.subf %100, %99 : vector<1x16x16xf32>
    %102 = arith.mulf %98, %101 : vector<1x16x16xf32>
    %103 = arith.mulf %93, %102 : vector<1x16x16xf32>
    %104 = vector.broadcast %97 : f32 to vector<1x16x16xf32>
    %105 = arith.addf %104, %103 : vector<1x16x16xf32>
    %106 = vector.extract_strided_slice %0 {offsets = [0, 0, 0], sizes = [1, 16, 1], strides = [1, 1, 1]} : vector<1x16x10xf32> to vector<1x16x1xf32>
    %c17 = arith.constant 17 : index
    %107 = memref.load %arg2[%c17] : memref<32xf32, #tpu.memory_space<smem>>
    %108 = vector.broadcast %107 : f32 to vector<1x16x1xf32>
    %109 = arith.mulf %106, %108 : vector<1x16x1xf32>
    %110 = vector.extract_strided_slice %0 {offsets = [0, 0, 0], sizes = [1, 16, 1], strides = [1, 1, 1]} : vector<1x16x10xf32> to vector<1x16x1xf32>
    %c22 = arith.constant 22 : index
    %111 = memref.load %arg2[%c22] : memref<32xf32, #tpu.memory_space<smem>>
    %112 = vector.broadcast %111 : f32 to vector<1x16x1xf32>
    %113 = arith.mulf %110, %112 : vector<1x16x1xf32>
    %114 = vector.extract_strided_slice %0 {offsets = [0, 0, 5], sizes = [1, 16, 1], strides = [1, 1, 1]} : vector<1x16x10xf32> to vector<1x16x1xf32>
    %c18 = arith.constant 18 : index
    %115 = memref.load %arg2[%c18] : memref<32xf32, #tpu.memory_space<smem>>
    %116 = vector.broadcast %115 : f32 to vector<1x16x1xf32>
    %117 = arith.mulf %114, %116 : vector<1x16x1xf32>
    %118 = arith.addf %109, %117 : vector<1x16x1xf32>
    %119 = vector.extract_strided_slice %0 {offsets = [0, 0, 5], sizes = [1, 16, 1], strides = [1, 1, 1]} : vector<1x16x10xf32> to vector<1x16x1xf32>
    %c23 = arith.constant 23 : index
    %120 = memref.load %arg2[%c23] : memref<32xf32, #tpu.memory_space<smem>>
    %121 = vector.broadcast %120 : f32 to vector<1x16x1xf32>
    %122 = arith.mulf %119, %121 : vector<1x16x1xf32>
    %123 = arith.addf %113, %122 : vector<1x16x1xf32>
    %124 = vector.extract_strided_slice %0 {offsets = [0, 0, 6], sizes = [1, 16, 1], strides = [1, 1, 1]} : vector<1x16x10xf32> to vector<1x16x1xf32>
    %c19 = arith.constant 19 : index
    %125 = memref.load %arg2[%c19] : memref<32xf32, #tpu.memory_space<smem>>
    %126 = vector.broadcast %125 : f32 to vector<1x16x1xf32>
    %127 = arith.mulf %124, %126 : vector<1x16x1xf32>
    %128 = arith.addf %118, %127 : vector<1x16x1xf32>
    %129 = vector.extract_strided_slice %0 {offsets = [0, 0, 6], sizes = [1, 16, 1], strides = [1, 1, 1]} : vector<1x16x10xf32> to vector<1x16x1xf32>
    %c24 = arith.constant 24 : index
    %130 = memref.load %arg2[%c24] : memref<32xf32, #tpu.memory_space<smem>>
    %131 = vector.broadcast %130 : f32 to vector<1x16x1xf32>
    %132 = arith.mulf %129, %131 : vector<1x16x1xf32>
    %133 = arith.addf %123, %132 : vector<1x16x1xf32>
    %134 = vector.extract_strided_slice %0 {offsets = [0, 0, 7], sizes = [1, 16, 1], strides = [1, 1, 1]} : vector<1x16x10xf32> to vector<1x16x1xf32>
    %c20 = arith.constant 20 : index
    %135 = memref.load %arg2[%c20] : memref<32xf32, #tpu.memory_space<smem>>
    %136 = vector.broadcast %135 : f32 to vector<1x16x1xf32>
    %137 = arith.mulf %134, %136 : vector<1x16x1xf32>
    %138 = arith.addf %128, %137 : vector<1x16x1xf32>
    %139 = vector.extract_strided_slice %0 {offsets = [0, 0, 7], sizes = [1, 16, 1], strides = [1, 1, 1]} : vector<1x16x10xf32> to vector<1x16x1xf32>
    %c25 = arith.constant 25 : index
    %140 = memref.load %arg2[%c25] : memref<32xf32, #tpu.memory_space<smem>>
    %141 = vector.broadcast %140 : f32 to vector<1x16x1xf32>
    %142 = arith.mulf %139, %141 : vector<1x16x1xf32>
    %143 = arith.addf %133, %142 : vector<1x16x1xf32>
    %144 = vector.extract_strided_slice %0 {offsets = [0, 0, 9], sizes = [1, 16, 1], strides = [1, 1, 1]} : vector<1x16x10xf32> to vector<1x16x1xf32>
    %c21 = arith.constant 21 : index
    %145 = memref.load %arg2[%c21] : memref<32xf32, #tpu.memory_space<smem>>
    %146 = vector.broadcast %145 : f32 to vector<1x16x1xf32>
    %147 = arith.mulf %144, %146 : vector<1x16x1xf32>
    %148 = arith.addf %138, %147 : vector<1x16x1xf32>
    %149 = vector.extract_strided_slice %0 {offsets = [0, 0, 9], sizes = [1, 16, 1], strides = [1, 1, 1]} : vector<1x16x10xf32> to vector<1x16x1xf32>
    %c26 = arith.constant 26 : index
    %150 = memref.load %arg2[%c26] : memref<32xf32, #tpu.memory_space<smem>>
    %151 = vector.broadcast %150 : f32 to vector<1x16x1xf32>
    %152 = arith.mulf %149, %151 : vector<1x16x1xf32>
    %153 = arith.addf %143, %152 : vector<1x16x1xf32>
    %c27 = arith.constant 27 : index
    %154 = memref.load %arg2[%c27] : memref<32xf32, #tpu.memory_space<smem>>
    %155 = vector.broadcast %154 : f32 to vector<1x16x1xf32>
    %156 = arith.addf %148, %155 : vector<1x16x1xf32>
    %157 = vector.shape_cast %5 : vector<16x16xf32> to vector<1x16x16xf32>
    %158 = vector.broadcast %153 : vector<1x16x1xf32> to vector<1x16x16xf32>
    %159 = arith.mulf %158, %157 : vector<1x16x16xf32>
    %cst_8 = arith.constant dense<0.000000e+00> : vector<1x16xf32>
    %160 = vector.multi_reduction <add>, %159, %cst_8 [1] : vector<1x16x16xf32> to vector<1x16xf32>
    %161 = vector.shape_cast %160 : vector<1x16xf32> to vector<1x1x16xf32>
    %162 = vector.broadcast %156 : vector<1x16x1xf32> to vector<1x16x16xf32>
    %163 = vector.broadcast %161 : vector<1x1x16xf32> to vector<1x16x16xf32>
    %164 = arith.addf %162, %163 : vector<1x16x16xf32>
    %165 = vector.extract_strided_slice %0 {offsets = [0, 0, 1], sizes = [1, 16, 1], strides = [1, 1, 1]} : vector<1x16x10xf32> to vector<1x16x1xf32>
    %166 = vector.extract_strided_slice %0 {offsets = [0, 0, 2], sizes = [1, 16, 1], strides = [1, 1, 1]} : vector<1x16x10xf32> to vector<1x16x1xf32>
    %167 = vector.shape_cast %5 : vector<16x16xf32> to vector<1x16x16xf32>
    %168 = vector.broadcast %165 : vector<1x16x1xf32> to vector<1x16x16xf32>
    %169 = arith.mulf %168, %167 : vector<1x16x16xf32>
    %cst_9 = arith.constant dense<0.000000e+00> : vector<1x16xf32>
    %170 = vector.multi_reduction <add>, %169, %cst_9 [1] : vector<1x16x16xf32> to vector<1x16xf32>
    %171 = vector.shape_cast %170 : vector<1x16xf32> to vector<1x1x16xf32>
    %172 = vector.broadcast %165 : vector<1x16x1xf32> to vector<1x16x16xf32>
    %173 = vector.broadcast %171 : vector<1x1x16xf32> to vector<1x16x16xf32>
    %174 = arith.subf %172, %173 : vector<1x16x16xf32>
    %175 = vector.shape_cast %5 : vector<16x16xf32> to vector<1x16x16xf32>
    %176 = vector.broadcast %166 : vector<1x16x1xf32> to vector<1x16x16xf32>
    %177 = arith.mulf %176, %175 : vector<1x16x16xf32>
    %cst_10 = arith.constant dense<0.000000e+00> : vector<1x16xf32>
    %178 = vector.multi_reduction <add>, %177, %cst_10 [1] : vector<1x16x16xf32> to vector<1x16xf32>
    %179 = vector.shape_cast %178 : vector<1x16xf32> to vector<1x1x16xf32>
    %180 = vector.broadcast %166 : vector<1x16x1xf32> to vector<1x16x16xf32>
    %181 = vector.broadcast %179 : vector<1x1x16xf32> to vector<1x16x16xf32>
    %182 = arith.subf %180, %181 : vector<1x16x16xf32>
    %183 = arith.mulf %174, %174 : vector<1x16x16xf32>
    %184 = arith.mulf %182, %182 : vector<1x16x16xf32>
    %185 = arith.addf %183, %184 : vector<1x16x16xf32>
    %cst_11 = arith.constant 9.99999993E-9 : f32
    %186 = vector.broadcast %cst_11 : f32 to vector<1x16x16xf32>
    %187 = arith.addf %185, %186 : vector<1x16x16xf32>
    %188 = math.sqrt %187 : vector<1x16x16xf32>
    %189 = vector.extract_strided_slice %0 {offsets = [0, 0, 3], sizes = [1, 16, 1], strides = [1, 1, 1]} : vector<1x16x10xf32> to vector<1x16x1xf32>
    %190 = vector.extract_strided_slice %0 {offsets = [0, 0, 4], sizes = [1, 16, 1], strides = [1, 1, 1]} : vector<1x16x10xf32> to vector<1x16x1xf32>
    %191 = vector.shape_cast %5 : vector<16x16xf32> to vector<1x16x16xf32>
    %192 = vector.broadcast %189 : vector<1x16x1xf32> to vector<1x16x16xf32>
    %193 = arith.mulf %192, %191 : vector<1x16x16xf32>
    %cst_12 = arith.constant dense<0.000000e+00> : vector<1x16xf32>
    %194 = vector.multi_reduction <add>, %193, %cst_12 [1] : vector<1x16x16xf32> to vector<1x16xf32>
    %195 = vector.shape_cast %194 : vector<1x16xf32> to vector<1x1x16xf32>
    %196 = vector.broadcast %189 : vector<1x16x1xf32> to vector<1x16x16xf32>
    %197 = vector.broadcast %195 : vector<1x1x16xf32> to vector<1x16x16xf32>
    %198 = arith.subf %196, %197 : vector<1x16x16xf32>
    %199 = vector.shape_cast %5 : vector<16x16xf32> to vector<1x16x16xf32>
    %200 = vector.broadcast %190 : vector<1x16x1xf32> to vector<1x16x16xf32>
    %201 = arith.mulf %200, %199 : vector<1x16x16xf32>
    %cst_13 = arith.constant dense<0.000000e+00> : vector<1x16xf32>
    %202 = vector.multi_reduction <add>, %201, %cst_13 [1] : vector<1x16x16xf32> to vector<1x16xf32>
    %203 = vector.shape_cast %202 : vector<1x16xf32> to vector<1x1x16xf32>
    %204 = vector.broadcast %190 : vector<1x16x1xf32> to vector<1x16x16xf32>
    %205 = vector.broadcast %203 : vector<1x1x16xf32> to vector<1x16x16xf32>
    %206 = arith.subf %204, %205 : vector<1x16x16xf32>
    %207 = arith.mulf %198, %198 : vector<1x16x16xf32>
    %208 = arith.mulf %206, %206 : vector<1x16x16xf32>
    %209 = arith.addf %207, %208 : vector<1x16x16xf32>
    %cst_14 = arith.constant 9.99999993E-9 : f32
    %210 = vector.broadcast %cst_14 : f32 to vector<1x16x16xf32>
    %211 = arith.addf %209, %210 : vector<1x16x16xf32>
    %212 = math.sqrt %211 : vector<1x16x16xf32>
    %c28 = arith.constant 28 : index
    %213 = memref.load %arg2[%c28] : memref<32xf32, #tpu.memory_space<smem>>
    %214 = vector.broadcast %213 : f32 to vector<1x16x16xf32>
    %215 = arith.mulf %212, %214 : vector<1x16x16xf32>
    %c29 = arith.constant 29 : index
    %216 = memref.load %arg2[%c29] : memref<32xf32, #tpu.memory_space<smem>>
    %217 = vector.broadcast %216 : f32 to vector<1x16x16xf32>
    %218 = arith.addf %215, %217 : vector<1x16x16xf32>
    %cst_15 = arith.constant 9.99999974E-5 : f32
    %219 = vector.broadcast %cst_15 : f32 to vector<1x16x16xf32>
    %220 = arith.addf %188, %219 : vector<1x16x16xf32>
    %221 = tpu.reciprocal %220 {approx = true} : vector<1x16x16xf32> -> vector<1x16x16xf32>
    %222 = arith.mulf %220, %221 : vector<1x16x16xf32>
    %cst_16 = arith.constant 2.000000e+00 : f32
    %223 = vector.broadcast %cst_16 : f32 to vector<1x16x16xf32>
    %224 = arith.subf %223, %222 : vector<1x16x16xf32>
    %225 = arith.mulf %221, %224 : vector<1x16x16xf32>
    %cst_17 = arith.constant 3.000000e+01 : f32
    %226 = vector.broadcast %cst_17 : f32 to vector<1x16x16xf32>
    %227 = arith.mulf %226, %225 : vector<1x16x16xf32>
    %228 = arith.mulf %227, %105 : vector<1x16x16xf32>
    %229 = arith.mulf %228, %164 : vector<1x16x16xf32>
    %230 = arith.mulf %229, %218 : vector<1x16x16xf32>
    %cst_18 = arith.constant 9.000000e+02 : f32
    %231 = vector.broadcast %cst_18 : f32 to vector<1x16x16xf32>
    %232 = arith.cmpf ogt, %185, %231 : vector<1x16x16xf32>
    %cst_19 = arith.constant 0xFF800000 : f32
    %233 = vector.broadcast %cst_19 : f32 to vector<1x16x16xf32>
    %234 = arith.select %232, %233, %230 : vector<1x16x16xi1>, vector<1x16x16xf32>
    %cst_20 = arith.constant dense<0xFF800000> : vector<1x16xf32>
    %235 = vector.multi_reduction <maximumf>, %234, %cst_20 [2] : vector<1x16x16xf32> to vector<1x16xf32>
    %236 = vector.shape_cast %235 : vector<1x16xf32> to vector<1x16x1xf32>
    %237 = vector.broadcast %236 : vector<1x16x1xf32> to vector<1x16x16xf32>
    %238 = arith.subf %234, %237 : vector<1x16x16xf32>
    %239 = math.exp %238 : vector<1x16x16xf32>
    %cst_21 = arith.constant dense<0.000000e+00> : vector<1x16xf32>
    %240 = vector.multi_reduction <add>, %239, %cst_21 [2] : vector<1x16x16xf32> to vector<1x16xf32>
    %241 = vector.shape_cast %240 : vector<1x16xf32> to vector<1x16x1xf32>
    %242 = tpu.reciprocal %241 {approx = true} : vector<1x16x1xf32> -> vector<1x16x1xf32>
    %243 = arith.mulf %241, %242 : vector<1x16x1xf32>
    %cst_22 = arith.constant 2.000000e+00 : f32
    %244 = vector.broadcast %cst_22 : f32 to vector<1x16x1xf32>
    %245 = arith.subf %244, %243 : vector<1x16x1xf32>
    %246 = arith.mulf %242, %245 : vector<1x16x1xf32>
    %247 = vector.broadcast %246 : vector<1x16x1xf32> to vector<1x16x16xf32>
    %248 = arith.mulf %239, %247 : vector<1x16x16xf32>
    %c0_23 = arith.constant 0 : index
    %c0_24 = arith.constant 0 : index
    %c0_25 = arith.constant 0 : index
    %249 = vector.load %arg3[%c0_23, %c0_24, %c0_25] : memref<1x16x16xf32, #tpu.memory_space<vmem>>, vector<1x16x16xf32>
    tpu.vector_store %arg3[%c0_23, %c0_24, %c0_25], %248 {strides = array<i32>} : memref<1x16x16xf32, #tpu.memory_space<vmem>>, vector<1x16x16xf32>,
    %cst_26 = arith.constant 0.000000e+00 : f32
    %250 = vector.broadcast %cst_26 : f32 to vector<1x16x16xf32>
    %251 = arith.cmpf one, %248, %250 : vector<1x16x16xf32>
    %cst_27 = arith.constant 1.000000e+00 : f32
    %cst_28 = arith.constant 0.000000e+00 : f32
    %252 = vector.broadcast %cst_27 : f32 to vector<1x16x16xf32>
    %253 = vector.broadcast %cst_28 : f32 to vector<1x16x16xf32>
    %254 = arith.select %251, %252, %253 : vector<1x16x16xi1>, vector<1x16x16xf32>
    %cst_29 = arith.constant dense<0.000000e+00> : vector<1x16xf32>
    %255 = vector.multi_reduction <add>, %254, %cst_29 [2] : vector<1x16x16xf32> to vector<1x16xf32>
    %256 = vector.shape_cast %255 : vector<1x16xf32> to vector<1x16x1xf32>
    %257 = arith.fptosi %256 : vector<1x16x1xf32> to vector<1x16x1xi32>
    %c1_i32 = arith.constant 1 : i32
    %258 = vector.broadcast %c1_i32 : i32 to vector<1x16x1xi32>
    %259 = arith.subi %257, %258 : vector<1x16x1xi32>
    %c0_30 = arith.constant 0 : index
    %c0_31 = arith.constant 0 : index
    %c0_32 = arith.constant 0 : index
    %260 = vector.load %arg4[%c0_30, %c0_31, %c0_32] : memref<1x16x1xi32, #tpu.memory_space<vmem>>, vector<1x16x1xi32>
    tpu.vector_store %arg4[%c0_30, %c0_31, %c0_32], %259 {strides = array<i32>} : memref<1x16x1xi32, #tpu.memory_space<vmem>>, vector<1x16x1xi32>,
    return
  }
  func.func @transform_0(%arg0: i32) -> (i32, i32, i32) {
    %c0_i32 = arith.constant 0 : i32
    %c0_i32_0 = arith.constant 0 : i32
    %c0_i32_1 = arith.constant 0 : i32
    return %arg0, %c0_i32, %c0_i32_0 : i32, i32, i32
  }
  func.func @transform_1(%arg0: i32) -> i32 {
    %c0_i32 = arith.constant 0 : i32
    %c0_i32_0 = arith.constant 0 : i32
    return %c0_i32 : i32
  }
  func.func @transform_2(%arg0: i32) -> (i32, i32, i32) {
    %c0_i32 = arith.constant 0 : i32
    %c0_i32_0 = arith.constant 0 : i32
    %c0_i32_1 = arith.constant 0 : i32
    return %arg0, %c0_i32, %c0_i32_0 : i32, i32, i32
  }
  func.func @transform_3(%arg0: i32) -> (i32, i32, i32) {
    %c0_i32 = arith.constant 0 : i32
    %c0_i32_0 = arith.constant 0 : i32
    %c0_i32_1 = arith.constant 0 : i32
    return %arg0, %c0_i32, %c0_i32_0 : i32, i32, i32
  }
}

</mosaic_0001>

<bundles_post_ra>
// kernel: graph_attention_forward.1
= control target key start
LH: loop header
LB: loop body
LE: loop exit
PB: predicated region body
PF: predicated region fallthrough
CT: control target
= control target key end

     0   :  { %9 = vsyncpa [#allocation4], 0  ;;  %s1540_s0 = inlined_call_operand.vmem [shape: f32[2,16,10], index: 0, kind: input, shape index: {}]   ;;  %s1541_s1 = inlined_call_operand.vmem [shape: f32[32], index: 1, kind: input, shape index: {}]   ;;  %s1542_s2 = inlined_call_operand.hbm [shape: f32[2,16,16], index: 2, kind: output, shape index: {0}]   ;;  %s1543_s3 = inlined_call_operand.vmem [shape: s32[2,16,1], index: 3, kind: output, shape index: {1}]  }
   0x1   :  { %10 = vsyncpa [#allocation3], 0 }
   0x2   :  { %12 = vsyncpa [#allocation3 + $0x1], 0  ;;  %s1205_s12 = smov 0   ;;  %s1207_s13 = smov 0  }
   0x3   :  { %s1209_s14 = smov 0   ;;  %s1211_s15 = smov 0  }
   0x4 LB: > { %s1226_s16 = sadd.s32 4294967295, %s1169_s15   ;;  %s908_s17 = sadd.s32 4294967294, %s1169_s15   ;;  %s1169_s15 = sphi %s1211_s15, %s1549_s15   ;;  %s1165_s14 = sphi %s1209_s14, %s1548_s14   ;;  %s1161_s13 = sphi %s1207_s13, %s1547_s13   ;;  %s1157_s12 = sphi %s1205_s12, %s1546_s12  }
   0x5   : > { %s1230_s18 = sadd.s32 1, %s1169_s15   ;;  %s72_s19 = sadd.s32 1, %s1165_s14 }
   0x6   : > { %s69_s20 = ssub.s32 %s1169_s15, %s1230_s18  ;;  %p82_p0 = scmp.ne.s32.totalorder %s1165_s14, %s1161_s13 }
   0x7   : > { %p70_p1 = scmp.eq.s32.totalorder %s69_s20, 0  ;;  %p83_p2 = scmp.eq.s32.totalorder %s1226_s16, 1 }
   0x8   : > { %p88_p3 = scmp.ne.s32.totalorder %s1161_s13, %s1157_s12  ;;  %p89_p4 = scmp.eq.s32.totalorder %s908_s17, 1 }
   0x9   : > { %s1241_s21 = scalar_select %p70_p1, %s1165_s14, %s72_s19  }
   0xa   : > { %p1243_p5 = por %p83_p2, %p82_p0  ;;  %p1247_p6 = por %p89_p4, %p88_p3 }
   0xb   : > { %p909_p7 = scmp.ge.s32.totalorder %s1169_s15, 1  ;;  %p122_p8 = scmp.lt.s32.totalorder %s1169_s15, 3 }
   0xc   : > { %p984_p9 = scmp.eq.s32.totalorder %s1226_s16, 0  ;;  %s134_s26 = sshll.u32 %s1541_s1, 4  ;;  %s135_s26 = int_to_ptr.vmem [resolvable:$true] %s134_s26 }
   0xd   : > { %p123_p10 = pnand %p909_p7, %p122_p8  ;;  %s1171_s27 = smov [#allocation2]  }
   0xf   : > { %p976_p11 = pneg %p123_p10  ;;  %155 = sbr.rel (%p123_p10) target bundleno = 733 (0x2dd), region = 28 }
  0x11   : > { %p977_p12 = pnand %p984_p9, %p976_p11 }
  0x13   : > { %979 = dma.vmem_to_smem (!%p977_p12), %s135_s26, 16, %s1171_s27, [#allocation4]  }
  0x14   : > { %1148 = dma.done.wait (%p984_p9), [#allocation4], 16  }
  0x15   : > { %1150 = vsyncadd (%p984_p9), [#allocation4], 4294967280 }
  0x16   : > { %162 = sfence }
  0x17   : > { %p186_p13 = scmp.lt.s32.totalorder %s1226_s16, 1  ;;  %v1172_v0 = vmov 1   ;;  %v1173_v1 = vmov 8   ;;  %s940_s28 = sld [smem:[#allocation2 + $0x17]]  ;;  %v1174_v2 = vmov 2   ;;  %v1177_v11 = vmov 3  }
  0x18   : > { %1034 = vset.pattern.permute.xlu2 %v1172_v0  ;;  %1033 = vset.pattern.permute.xlu1 %v1173_v1  ;;  %s942_s7 = sld [smem:[#allocation2 + $0x18]]  ;;  %s1175_s8 = smov 123   ;;  %v1179_v18 = vmov 4   ;;  %v198_v41 = vlaneseq  ;;  %v1181_v48 = vmov 0.0   ;;  %vm221_vm2 = vcmask 130048  }
  0x19   : > { %s1260_s29 = scalar_select %p186_p13, %s1226_s16, 1  ;;  %1035 = vset.pattern.permute.xlu0 %v1174_v2 }
  0x1a   : > { %s944_s9 = sld [smem:[#allocation2 + $0x19]]  ;;  %s1176_s10 = smov 122   ;;  %v199_v43 = vshrl.u32 %v198_v41, 7  ;;  %v202_v44 = vand.u32 127, %v198_v41 }
  0x1b   : > { %s957_s30 = sshll.u32 %s1260_s29, 4  ;;  %s946_s11 = sld [smem:[#allocation2 + $0x1a]] }
  0x1c   : > { %s190_s6 = scalar_lea.vmem %s1540_s0, %s957_s30  ;;  %s939_s17 = sld [smem:[#allocation2 + $0x12]]  ;;  %vm203_vm0 = vcmp.eq.s32.totalorder %v199_v43, %v202_v44  ;;  %v200_v46 = vadd.s32 8, %v199_v43 }
  0x1d   : > { %v1268_v3 = vld [vmem:[%s190_s6] sm:$0xff]  ;;  %v426_v4 = vstv %s940_s28  ;;  %v1274_v6 = vld [vmem:[%s190_s6 + $0x8] sm:$0xff]  ;;  %s1178_s19 = smov 121   ;;  %s941_s20 = sld [smem:[#allocation2 + $0x13]]  ;;  %v1331_v49 = vsel %vm203_vm0, 1.0, %v1181_v48 }
  0x1e   : > { %561 = vperm.xlu2 %1034, %v1268_v3   ;;  %211 = vperm.xlu1 %1033, %v1268_v3   ;;  %v427_v5 = vmul.f32 %v426_v4, %v1268_v3  ;;  %v428_v7 = vmul.f32 %v426_v4, %v1274_v6  ;;  %v454_v8 = vstv %s942_s7  ;;  %s1180_s24 = smov 119   ;;  %s943_s25 = sld [smem:[#allocation2 + $0x14]]  ;;  %vm204_vm1 = vcmp.eq.s32.totalorder %v200_v46, %v202_v44 }
  0x1f   : > { %v455_v9 = vmul.f32 %v454_v8, %v1268_v3  ;;  %v456_v13 = vmul.f32 %v454_v8, %v1274_v6  ;;  %s231_s26 = sld [smem:[#allocation2]]  ;;  %v1335_v51 = vsel %vm204_vm1, 1.0, %v1181_v48 }
  0x20   : > { %431 = vrot.lane.b32.xlu0 %v427_v5, %s1175_s8  ;;  %v482_v10 = vstv %s944_s9  ;;  %s1307_s27 = sld [smem:[#allocation2 + $0x6]] }
  0x21   : > { %v483_v12 = vmul.f32 %v482_v10, %v1268_v3  ;;  %v484_v14 = vmul.f32 %v482_v10, %v1274_v6  ;;  %v510_v15 = vstv %s946_s11  ;;  %s923_s28 = sld [smem:[#allocation2 + $0x2]] }
  0x22   : > { %v512_v16 = vmul.f32 %v510_v15, %v1274_v6  ;;  %v412_v17 = vstv %s939_s17  ;;  %v511_v19 = vmul.f32 %v510_v15, %v1268_v3  ;;  %s945_s4 = sld [smem:[#allocation2 + $0x15]] }
  0x23   : > { %v413_v20 = vmul.f32 %v412_v17, %v1268_v3  ;;  %v440_v21 = vstv %s941_s20  ;;  %v414_v23 = vmul.f32 %v412_v17, %v1274_v6  ;;  %s926_s5 = sld [smem:[#allocation2 + $0x4]] }
  0x24   : > { %v441_v22 = vmul.f32 %v440_v21, %v1268_v3  ;;  %v442_v24 = vmul.f32 %v440_v21, %v1274_v6  ;;  %v468_v25 = vstv %s943_s25  ;;  %s938_s6 = sld [smem:[#allocation2 + $0x16]] }
  0x25   : > { %v469_v26 = vmul.f32 %v468_v25, %v1268_v3  ;;  %v232_v27 = vstv %s231_s26  ;;  %v470_v31 = vmul.f32 %v468_v25, %v1274_v6  ;;  %s921_s7 = sld [smem:[#allocation2 + $0x1]] }
  0x26   : > { %565 = vperm.xlu2 %1034, %v1274_v6   ;;  %216 = vperm.xlu1 %1033, %v1274_v6   ;;  %v234_v28 = vmul.f32 %v232_v27, %v1274_v6  ;;  %v233_v29 = vmul.f32 %v232_v27, %v1268_v3  ;;  %v307_v30 = vstv %s1307_s27  ;;  %s1359_s9 = sld [smem:[#allocation2 + $0x11]] }
  0x27   : > { %v308_v32 = vmul.f32 %v307_v30, %v1268_v3  ;;  %v257_v33 = vstv %s923_s28  ;;  %v309_v45 = vmul.f32 %v307_v30, %v1274_v6  ;;  %s1377_s11 = sld [smem:[#allocation2 + $0x9]] }
  0x28   : > { %433 = vrot.lane.b32.xlu0 %v428_v7, %s1175_s8  ;;  %v259_v34 = vmul.f32 %v257_v33, %v1274_v6  ;;  %v496_v35 = vstv %s945_s4  ;;  %v258_v36 = vmul.f32 %v257_v33, %v1268_v3  ;;  %s1386_s17 = sld [smem:[#allocation2 + $0x8]] }
  0x29   : > { %v498_v37 = vmul.f32 %v496_v35, %v1274_v6  ;;  %v282_v38 = vstv %s926_s5  ;;  %v497_v42 = vmul.f32 %v496_v35, %v1268_v3  ;;  %s1396_s20 = sld [smem:[#allocation2 + $0x1b]] }
  0x2a   : > { %v284_v39 = vmul.f32 %v282_v38, %v1274_v6  ;;  %v283_v40 = vmul.f32 %v282_v38, %v1268_v3  ;;  %s1439_s25 = sld [smem:[#allocation2 + $0xa]] }
  0x2b   : > { %s1454_s26 = sld [smem:[#allocation2 + $0xc]] }
  0x2c   : > { %s1457_s27 = sld [smem:[#allocation2 + $0xd]] }
  0x2d   : > { %s1459_s28 = sld [smem:[#allocation2 + $0xe]] }
  0x2e   : > { %1036 = vset.pattern.permute.xlu1 %v1174_v2  ;;  %459 = vrot.lane.b32.xlu2 %v455_v9, %s1176_s10  ;;  %v1182_v2 = vmov 0   ;;  %s1463_s4 = sld [smem:[#allocation2 + $0xf]] }
  0x2f   : > { %586 = vperm.xlu1 %1036, %v1274_v6   ;;  %1038 = vset.pattern.permute.xlu2 %v1177_v11  ;;  %s936_s5 = sld [smem:[#allocation2 + $0x10]] }
  0x30   : > { %582 = vperm.xlu0 %1035, %v1268_v3  }
  0x36   : > { %487 = vrot.lane.b32.xlu2 %v483_v12, %s1178_s19 }
  0x37   : > { %461 = vrot.lane.b32.xlu1 %v456_v13, %s1176_s10 }
  0x38   : > { %1037 = vset.pattern.permute.xlu1 %v1177_v11  ;;  %489 = vrot.lane.b32.xlu0 %v484_v14, %s1178_s19 }
  0x39   : > { %1039 = vset.pattern.permute.xlu0 %v1179_v18 }
  0x3e   : > { %517 = vrot.lane.b32.xlu2 %v512_v16, %s1180_s24 }
  0x3f   : > { %515 = vrot.lane.b32.xlu1 %v511_v19, %s1180_s24  ;;  %v408_v19 = vstv %s938_s6  ;;  %s1485_s6 = sld [smem:[#allocation2 + $0x1c]] }
  0x40   : > { %417 = vrot.lane.b32.xlu0 %v413_v20, %s1175_s8  ;;  %v410_v25 = vmul.f32 %v408_v19, %v1274_v6 }
  0x46   : > { %445 = vrot.lane.b32.xlu2 %v441_v22, %s1176_s10 }
  0x47   : > { %419 = vrot.lane.b32.xlu1 %v414_v23, %s1175_s8  ;;  %s924_s8 = sld [smem:[#allocation2 + $0x3]] }
  0x48   : > { %447 = vrot.lane.b32.xlu0 %v442_v24, %s1176_s10  ;;  %v409_v24 = vmul.f32 %v408_v19, %v1268_v3  ;;  %s927_s10 = sld [smem:[#allocation2 + $0x5]] }
  0x4e   : > { %639 = vperm.xlu2 %1038, %v1274_v6  }
  0x4f   : > { %635 = vperm.xlu1 %1037, %v1268_v3  }
  0x50   : > { %656 = vperm.xlu0 %1039, %v1268_v3  }
  0x56   : > { %473 = vrot.lane.b32.xlu2 %v469_v26, %s1178_s19 }
  0x57   : > { %1040 = vset.pattern.permute.xlu1 %v1179_v18  ;;  %1041 = vset.pattern.permute.xlu2 %v1173_v1 }
  0x58   : > { %660 = vperm.xlu1 %1040, %v1274_v6   ;;  %1042 = vset.pattern.permute.xlu0 %v1173_v1 }
  0x59   : > { %245 = vperm.xlu0 %1042, %v234_v28  }
  0x5e   : > { %240 = vperm.xlu2 %1041, %v233_v29  }
  0x60   : > { %475 = vrot.lane.b32.xlu1 %v470_v31, %s1178_s19  ;;  %s1394_s19 = sld [smem:[#allocation2 + $0x7]] }
  0x61   : > { %1043 = vset.pattern.permute.xlu1 %v1173_v1  ;;  %315 = vperm.xlu0 %1042, %v308_v32  }
  0x66   : > { %270 = vperm.xlu2 %1041, %v259_v34  }
  0x68   : > { %265 = vperm.xlu1 %1043, %v258_v36  }
  0x69   : > { %503 = vrot.lane.b32.xlu0 %v498_v37, %s1180_s24 }
  0x6a   : > { %1046 = vset.pattern.permute.xlu0 %v1182_v2 }
  0x6e   : > { %295 = vperm.xlu2 %1041, %v284_v39  }
  0x70   : > { %290 = vperm.xlu1 %1043, %v283_v40  }
  0x76   : > { %501 = vrot.lane.b32.xlu2 %v497_v42, %s1180_s24  ;;  %s1434_s24 = sld [smem:[#allocation2 + $0xb]] }
  0x77   : > { %1045 = vset.pattern.permute.xlu2 %v1182_v2 }
  0x78   : > { %v562_v47 = vpop.permute.xlu2 %561  ;;  %320 = vperm.xlu1 %1043, %v309_v45  }
  0x79   : > { %v568_v50 = vmul.f32 %v1331_v49, %v562_v47 }
  0x7b   : > { %v570_v53 = vsel %vm221_vm2, %v568_v50, 0.0 }
  0x80   : > { %v566_v52 = vpop.permute.xlu2 %565  ;;  %1044 = vset.pattern.permute.xlu1 %v1182_v2 }
  0x81   : > { %v569_v54 = vmul.f32 %v1335_v51, %v566_v52 }
  0x83   : > { %v571_v55 = vsel %vm221_vm2, %v569_v54, 0.0 }
  0x84   : > { %v572_v56 = vadd.f32 %v571_v55, %v570_v53 }
  0x86   : > { %v573_v57 = vrot.slane %v572_v56, 4 }
  0x88   : > { %v574_v58 = vadd.f32 %v573_v57, %v572_v56  ;;  %v460_v59 = vpop.permute.xlu2 %459  ;;  %v236_v57 = vstv %s921_s7  ;;  %s1487_s7 = sld [smem:[#allocation2 + $0x1d]] }
  0x8a   : > { %v575_v60 = vrot.slane %v574_v58, 2 }
  0x8c   : > { %v576_v61 = vadd.f32 %v575_v60, %v574_v58 }
  0x8e   : > { %v577_v62 = vrot.slane %v576_v61, 1 }
  0x90   : > { %v578_v63 = vadd.f32 %v577_v62, %v576_v61  ;;  %v212_v0 = vpop.permute.xlu1 %211  ;;  %v488_v1 = vpop.permute.xlu2 %487 }
  0x91   : > { %v219_v8 = vmul.f32 %v1331_v49, %v212_v0 }
  0x92   : > { %v579_v4 = vsub.f32 %v562_v47, %v578_v63  ;;  %v580_v5 = vsub.f32 %v566_v52, %v578_v63  ;;  %v432_v7 = vpop.permute.xlu0 %431 }
  0x93   : > { %v222_v11 = vsel %vm221_vm2, %v219_v8, 0.0  ;;  %v437_v31 = vadd.f32 %v432_v7, %v409_v24 }
  0x94   : > { %v603_v60 = vmul.f32 %v580_v5, %v580_v5  ;;  %v602_v61 = vmul.f32 %v579_v4, %v579_v4  ;;  %v261_v5 = vstv %s924_s8  ;;  %s176_s8 = sand.u32 1, %s1161_s13  }
  0x95   : > { %v465_v40 = vadd.f32 %v460_v59, %v437_v31 }
  0x97   : > { %v493_v47 = vadd.f32 %v488_v1, %v465_v40 }
  0x98   : > { %v217_v9 = vpop.permute.xlu1 %216  ;;  %v518_v10 = vpop.permute.xlu2 %517 }
  0x99   : > { %v220_v12 = vmul.f32 %v1335_v51, %v217_v9 }
  0x9a   : > { %v434_v14 = vpop.permute.xlu0 %433 }
  0x9b   : > { %v223_v13 = vsel %vm221_vm2, %v220_v12, 0.0  ;;  %v438_v32 = vadd.f32 %v434_v14, %v410_v25  ;;  %v404_v12 = vstv %s1359_s9  ;;  %s914_s9 = sshll.u32 %s176_s8, 4 }
  0x9c   : > { %v224_v15 = vadd.f32 %v223_v13, %v222_v11  ;;  %v405_v19 = vmul.f32 %v404_v12, %v1268_v3 }
  0x9e   : > { %v225_v16 = vrot.slane %v224_v15, 4 }
  0xa0   : > { %v1344_v17 = vpop.permute.xlu2 %445  ;;  %v226_v22 = vadd.f32 %v225_v16, %v224_v15 }
  0xa1   : > { %v587_v20 = vpop.permute.xlu1 %586 }
  0xa2   : > { %v590_v21 = vmul.f32 %v1335_v51, %v587_v20  ;;  %v583_v23 = vpop.permute.xlu0 %582  ;;  %v227_v29 = vrot.slane %v226_v22, 2 }
  0xa3   : > { %v589_v27 = vmul.f32 %v1331_v49, %v583_v23 }
  0xa4   : > { %v592_v26 = vsel %vm221_vm2, %v590_v21, 0.0  ;;  %v228_v37 = vadd.f32 %v227_v29, %v226_v22  ;;  %v276_v29 = vstv %s1377_s11  ;;  %s959_s11 = sshll.u32 %s1226_s16, 4 }
  0xa5   : > { %v591_v28 = vsel %vm221_vm2, %v589_v27, 0.0 }
  0xa6   : > { %v593_v30 = vadd.f32 %v592_v26, %v591_v28  ;;  %v229_v44 = vrot.slane %v228_v37, 1 }
  0xa8   : > { %v1352_v33 = vpop.permute.xlu2 %639  ;;  %v594_v34 = vrot.slane %v593_v30, 4  ;;  %v1356_v54 = vadd.f32 %v229_v44, %v228_v37  ;;  %v251_v44 = vstv %s1386_s17 }
  0xa9   : > { %v462_v35 = vpop.permute.xlu1 %461  ;;  %v643_v11 = vmul.f32 %v1335_v51, %v1352_v33 }
  0xaa   : > { %v466_v36 = vadd.f32 %v462_v35, %v438_v32  ;;  %v595_v38 = vadd.f32 %v594_v34, %v593_v30  ;;  %v490_v39 = vpop.permute.xlu0 %489  ;;  %v237_v0 = vmul.f32 %v236_v57, %v1356_v54  ;;  %v1372_v4 = vmul.f32 %v261_v5, %v1356_v54 }
  0xab   : > { %v645_v21 = vsel %vm221_vm2, %v643_v11, 0.0 }
  0xac   : > { %v494_v41 = vadd.f32 %v490_v39, %v466_v36  ;;  %v596_v42 = vrot.slane %v595_v38, 2 }
  0xae   : > { %v522_v43 = vadd.f32 %v518_v10, %v494_v41  ;;  %v597_v45 = vadd.f32 %v596_v42, %v595_v38 }
  0xb0   : > { %v1354_v46 = vpop.permute.xlu2 %473  ;;  %534 = vperm.xlu2 %1045, %v522_v43   ;;  %v598_v50 = vrot.slane %v597_v45, 1 }
  0xb1   : > { %v516_v52 = vpop.permute.xlu1 %515 }
  0xb2   : > { %v521_v53 = vadd.f32 %v516_v52, %v493_v47  ;;  %v599_v55 = vadd.f32 %v598_v50, %v597_v45  ;;  %v418_v56 = vpop.permute.xlu0 %417  ;;  %v311_v52 = vstv %s1394_s19 }
  0xb3   : > { %v423_v26 = vadd.f32 %v418_v56, %v405_v19  ;;  %v524_v56 = vstv %s1396_s20  ;;  %s802_s20 = scalar_lea.hbm %s1542_s2, %s959_s11 }
  0xb4   : > { %529 = vperm.xlu1 %1044, %v521_v53   ;;  %v600_v58 = vsub.f32 %v583_v23, %v599_v55  ;;  %v601_v59 = vsub.f32 %v587_v20, %v599_v55  ;;  %v286_v23 = vstv %s927_s10  ;;  %v406_v53 = vmul.f32 %v404_v12, %v1274_v6  ;;  %s178_s10 = scalar_lea.vmem [#allocation5], %s914_s9 }
  0xb5   : > { %v1392_v28 = vmul.f32 %v286_v23, %v1356_v54  ;;  %v451_v35 = vadd.f32 %v1344_v17, %v423_v26 }
  0xb6   : > { %v604_v62 = vmul.f32 %v600_v58, %v600_v58  ;;  %v605_v63 = vmul.f32 %v601_v59, %v601_v59 }
  0xb7   : > { %v479_v17 = vadd.f32 %v1354_v46, %v451_v35  ;;  %v312_v46 = vmul.f32 %v311_v52, %v1356_v54 }
  0xb8   : > { %v241_v1 = vpop.permute.xlu2 %240  ;;  %v1361_v2 = vadd.f32 %v604_v62, %v602_v61  ;;  %v1363_v7 = vadd.f32 %v605_v63, %v603_v60 }
  0xb9   : > { %v1365_v8 = vadd.f32 %v241_v1, %v237_v0  ;;  %v1367_v9 = vpop.permute.xlu1 %419 }
  0xba   : > { %v1369_v10 = vpop.permute.xlu0 %447  ;;  %v1389_v25 = vadd.f32 1e-08, %v1361_v2  ;;  %v1421_v63 = vadd.f32 1e-08, %v1363_v7  ;;  %v424_v19 = vadd.f32 %v1367_v9, %v406_v53  ;;  %vm734_vm10 = vcmp.gt.f32.partialorder %v1361_v2, 900.0 }
  0xbb   : > { %v252_v26 = vadd.f32 %v251_v44, %v1365_v8  ;;  %vm735_vm12 = vcmp.gt.f32.partialorder %v1363_v7, 900.0 }
  0xbc   : > { %1048 = vrsqrt.f32 %v1389_v25  ;;  %vm617_vm3 = vcmp.eq.f32.partialorder %v1389_v25, inf  ;;  %vm619_vm4 = vcmp.eq.f32.partialorder %v1389_v25, 0.0  ;;  %vm629_vm5 = vcmp.eq.f32.partialorder %v1421_v63, inf }
  0xbd   : > { %1050 = vrsqrt.f32 %v1421_v63  ;;  %vm631_vm6 = vcmp.eq.f32.partialorder %v1421_v63, 0.0 }
  0xc0   : > { %v271_v13 = vpop.permute.xlu2 %270 }
  0xc1   : > { %v274_v14 = vadd.f32 %v271_v13, %v1372_v4  ;;  %v636_v15 = vpop.permute.xlu1 %635 }
  0xc2   : > { %v642_v16 = vmul.f32 %v1331_v49, %v636_v15  ;;  %v1382_v20 = vpop.permute.xlu0 %656  ;;  %v1049_v58 = vpop.eup %1048 }
  0xc3   : > { %v663_v31 = vmul.f32 %v1331_v49, %v1382_v20  ;;  %v1407_v38 = vadd.f32 %v276_v29, %v274_v14 }
  0xc4   : > { %v644_v22 = vsel %vm221_vm2, %v642_v16, 0.0  ;;  %v611_v16 = vmul.f32 %v1049_v58, %v1389_v25 }
  0xc5   : > { %v646_v24 = vadd.f32 %v645_v21, %v644_v22  ;;  %v665_v41 = vsel %vm221_vm2, %v663_v31, 0.0  ;;  %v280_v59 = vmax.f32 %v1407_v38, 0.0  ;;  %v452_v22 = vadd.f32 %v1369_v10, %v424_v19 }
  0xc7   : > { %v647_v27 = vrot.slane %v646_v24, 4 }
  0xc8   : > { %v296_v3 = vpop.permute.xlu2 %295 }
  0xc9   : > { %v648_v30 = vadd.f32 %v647_v27, %v646_v24  ;;  %v1402_v32 = vadd.f32 %v296_v3, %v1392_v28 }
  0xca   : > { %v661_v34 = vpop.permute.xlu1 %660 }
  0xcb   : > { %v649_v36 = vrot.slane %v648_v30, 2  ;;  %v664_v37 = vmul.f32 %v1335_v51, %v661_v34  ;;  %v246_v39 = vpop.permute.xlu0 %245 }
  0xcc   : > { %v249_v43 = vadd.f32 %v246_v39, %v237_v0 }
  0xcd   : > { %v650_v40 = vadd.f32 %v649_v36, %v648_v30  ;;  %v666_v42 = vsel %vm221_vm2, %v664_v37, 0.0  ;;  %v1051_v30 = vpop.eup %1050 }
  0xce   : > { %v667_v45 = vadd.f32 %v666_v42, %v665_v41  ;;  %v1412_v50 = vadd.f32 %v251_v44, %v249_v43  ;;  %v254_v42 = vmax.f32 %v252_v26, 0.0  ;;  %v623_v44 = vmul.f32 %v1051_v30, %v1421_v63 }
  0xcf   : > { %v651_v47 = vrot.slane %v650_v40, 1 }
  0xd0   : > { %v668_v55 = vrot.slane %v667_v45, 4  ;;  %v502_v57 = vpop.permute.xlu2 %501  ;;  %v255_v61 = vmax.f32 %v1412_v50, 0.0  ;;  %v624_v53 = vmul.f32 %v1051_v30, %v623_v44 }
  0xd1   : > { %v652_v60 = vadd.f32 %v651_v47, %v650_v40  ;;  %v507_v62 = vadd.f32 %v502_v57, %v479_v17 }
  0xd2   : > { %v669_v0 = vadd.f32 %v668_v55, %v667_v45  ;;  %v476_v1 = vpop.permute.xlu1 %475  ;;  %v1429_v11 = vmax.f32 %v255_v61, %v280_v59  ;;  %v301_v55 = vstv %s1439_s25  ;;  %s805_s25 = sshll.u32 %s802_s20, 4  ;;  %s806_s25 = int_to_ptr.hbm [resolvable:$true] %s805_s25 }
  0xd3   : > { %v653_v5 = vsub.f32 %v636_v15, %v652_v60  ;;  %v654_v6 = vsub.f32 %v1352_v33, %v652_v60  ;;  %v525_v12 = vadd.f32 %v524_v56, %v507_v62  ;;  %v316_v14 = vpop.permute.xlu0 %315  ;;  %v612_v33 = vmul.f32 %v1049_v58, %v611_v16 }
  0xd4   : > { %v670_v13 = vrot.slane %v669_v0, 2  ;;  %v323_v21 = vadd.f32 %v316_v14, %v312_v46  ;;  %v480_v27 = vadd.f32 %v476_v1, %v452_v22  ;;  %v303_v16 = vadd.f32 %v301_v55, %v1402_v32 }
  0xd5   : > { %550 = vperm.xlu0 %1046, %v525_v12   ;;  %v613_v36 = vmul.f32 0.5, %v612_v33  ;;  %v676_v10 = vmul.f32 %v653_v5, %v653_v5  ;;  %v677_v40 = vmul.f32 %v654_v6, %v654_v6 }
  0xd6   : > { %v671_v54 = vadd.f32 %v670_v13, %v669_v0  ;;  %v625_v0 = vmul.f32 0.5, %v624_v53 }
  0xd7   : > { %v614_v47 = vsub.f32 1.5, %v613_v36  ;;  %v362_v36 = vstv %s1454_s26  ;;  %s786_s26 = scalar_lea.sflag [#allocation3], %s176_s8 }
  0xd8   : > { %v672_v15 = vrot.slane %v671_v54, 1  ;;  %v626_v14 = vsub.f32 1.5, %v625_v0 }
  0xd9   : > { %v615_v57 = vmul.f32 %v1049_v58, %v614_v47 }
  0xda   : > { %v673_v23 = vadd.f32 %v672_v15, %v671_v54  ;;  %v266_v24 = vpop.permute.xlu1 %265 }
  0xdb   : > { %v273_v3 = vadd.f32 %v266_v24, %v1372_v4  ;;  %v504_v35 = vpop.permute.xlu0 %503  ;;  %v616_v1 = vmul.f32 %v615_v57, %v1389_v25  ;;  %v305_v24 = vmax.f32 %v303_v16, 0.0 }
  0xdc   : > { %v674_v9 = vsub.f32 %v1382_v20, %v673_v23  ;;  %v675_v31 = vsub.f32 %v661_v34, %v673_v23  ;;  %v508_v39 = vadd.f32 %v504_v35, %v480_v27  ;;  %v326_v34 = vstv %s1434_s24  ;;  %s803_s24 = sshll.u32 %s178_s10, 4  ;;  %s804_s24 = int_to_ptr.vmem [resolvable:$true] %s803_s24 }
  0xdd   : > { %v277_v37 = vadd.f32 %v276_v29, %v273_v3  ;;  %1047 = vset.pattern.permute.xlu0 %v1179_v18  ;;  %v327_v18 = vadd.f32 %v326_v34, %v323_v21  ;;  %v627_v23 = vmul.f32 %v1051_v30, %v626_v14 }
  0xde   : > { %v678_v41 = vmul.f32 %v674_v9, %v674_v9  ;;  %v679_v8 = vmul.f32 %v675_v31, %v675_v31  ;;  %v526_v43 = vadd.f32 %v524_v56, %v508_v39 }
  0xdf   : > { %v279_v4 = vmax.f32 %v277_v37, 0.0  ;;  %v329_v62 = vmax.f32 %v327_v18, 0.0  ;;  %v366_v37 = vstv %s1457_s27  ;;  %s1117_s27 = sshra.s32 %s806_s25, 4  ;;  %s1118_s27 = int_to_ptr.hbm [resolvable:$true] %s1117_s27 }
  0xe0   : > { %v1444_v45 = vadd.f32 %v678_v41, %v676_v10  ;;  %v1446_v20 = vadd.f32 %v679_v8, %v677_v40  ;;  %555 = vperm.xlu1 %1044, %v526_v43   ;;  %v372_v8 = vstv %s1459_s28  ;;  %s1119_s16 = scalar_lea.hbm %s1118_s27, 16  ;;  %p1124_p3 = scmp.lt.s32.totalorder %s1118_s27, %s1542_s2 }
  0xe1   : > { %v331_v29 = vmax.f32 %v254_v42, %v279_v4  ;;  %p1120_p0 = scmp.ne.s32.totalorder %s1118_s27, %s1119_s16 }
  0xe2   : > { %v291_v17 = vpop.permute.xlu1 %290 }
  0xe3   : > { %v298_v52 = vadd.f32 %v291_v17, %v1392_v28  ;;  %v618_v28 = vsel %vm617_vm3, %v1389_v25, %v616_v1  ;;  %v378_v17 = vstv %s1463_s4  ;;  %p1121_p1 = pnand %p1120_p0, %p1243_p5 }
  0xe5   : > { %v302_v60 = vadd.f32 %v301_v55, %v298_v52  ;;  %p1122_p2 = pneg %p1121_p1 }
  0xe7   : > { %v304_v56 = vmax.f32 %v302_v60, 0.0 }
  0xe9   : > { %v333_v5 = vmax.f32 %v304_v56, %v329_v62 }
  0xea   : > { %v321_v6 = vpop.permute.xlu1 %320 }
  0xeb   : > { %v335_v12 = vmax.f32 %v331_v29, %v333_v5  ;;  %v324_v13 = vadd.f32 %v321_v6, %v312_v46  ;;  %v620_v46 = vand.u32 2147483648, %v1389_v25  ;;  %v628_v25 = vmul.f32 %v627_v23, %v1421_v63 }
  0xed   : > { %v337_v58 = vsub.f32 %v254_v42, %v335_v12  ;;  %v343_v19 = vsub.f32 %v279_v4, %v335_v12  ;;  %v349_v21 = vsub.f32 %v304_v56, %v335_v12  ;;  %v355_v54 = vsub.f32 %v329_v62, %v335_v12 }
  0xee   : > { %v328_v15 = vadd.f32 %v326_v34, %v324_v13  ;;  %v621_v3 = vsel %vm619_vm4, %v620_v46, %v618_v28  ;;  %v630_v42 = vsel %vm629_vm5, %v1421_v63, %v628_v25 }
  0xef   : > { %v339_v33 = vmul.f32 1.442695, %v337_v58  ;;  %v345_v22 = vmul.f32 1.442695, %v343_v19  ;;  %v351_v32 = vmul.f32 1.442695, %v349_v21 }
  0xf0   : > { %v357_v26 = vmul.f32 1.442695, %v355_v54  ;;  %v330_v27 = vmax.f32 %v328_v15, 0.0  ;;  %v716_v31 = vadd.f32 0.0001, %v621_v3 }
  0xf1   : > { %1052 = vpow2.f32 %v339_v33 }
  0xf2   : > { %1054 = vpow2.f32 %v345_v22  ;;  %v334_v9 = vmax.f32 %v305_v24, %v330_v27 }
  0xf3   : > { %1056 = vpow2.f32 %v351_v32 }
  0xf4   : > { %1058 = vpow2.f32 %v357_v26  ;;  %v336_v35 = vmax.f32 %v1429_v11, %v334_v9  ;;  %v632_v11 = vand.u32 2147483648, %v1421_v63  ;;  %v400_v9 = vstv %s936_s5  ;;  %s1123_s5 = scalar_lea.hbm %s1542_s2, 32 }
  0xf5   : > { %1060 = vrcp.f32 %v716_v31  ;;  %p1125_p4 = scmp.lt.s32.totalorder %s1123_s5, %s1119_s16 }
  0xf6   : > { %v338_v30 = vsub.f32 %v255_v61, %v336_v35  ;;  %v344_v39 = vsub.f32 %v280_v59, %v336_v35  ;;  %v350_v10 = vsub.f32 %v305_v24, %v336_v35  ;;  %v356_v40 = vsub.f32 %v330_v27, %v336_v35 }
  0xf7   : > { %v1053_v41 = vpop.eup %1052  ;;  %v633_v18 = vsel %vm631_vm6, %v632_v11, %v630_v42  ;;  %p1126_p7 = por %p1125_p4, %p1124_p3 }
  0xf8   : > { %v1055_v4 = vpop.eup %1054  ;;  %v341_v43 = vmul.f32 1.442695, %v338_v30  ;;  %v347_v44 = vmul.f32 1.442695, %v344_v39  ;;  %v353_v34 = vmul.f32 1.442695, %v350_v10  ;;  %v363_v47 = vmul.f32 %v1053_v41, %v362_v36 }
  0xf9   : > { %v1057_v50 = vpop.eup %1056  ;;  %v383_v61 = vadd.f32 %v1055_v4, %v1053_v41  ;;  %v359_v29 = vmul.f32 1.442695, %v356_v40  ;;  %v367_v38 = vmul.f32 %v1055_v4, %v366_v37  ;;  %v717_v0 = vadd.f32 0.0001, %v633_v18  ;;  %p1127_p8 = pnand %p1126_p7, %p1122_p2 }
  0xfa   : > { %v1059_v59 = vpop.eup %1058  ;;  %1062 = vpow2.f32 %v341_v43  ;;  %v373_v52 = vmul.f32 %v1057_v50, %v372_v8 }
  0xfb   : > { %v385_v53 = vadd.f32 %v1057_v50, %v383_v61  ;;  %1064 = vpow2.f32 %v347_v44  ;;  %v369_v55 = vadd.f32 %v367_v38, %v363_v47  ;;  %v1061_v57 = vpop.eup %1060  ;;  %v379_v62 = vmul.f32 %v1059_v59, %v378_v17 }
  0xfc   : > { %1066 = vpow2.f32 %v353_v34  ;;  %v720_v63 = vmul.f32 %v1061_v57, %v716_v31  ;;  %v682_v44 = vadd.f32 1e-08, %v1444_v45  ;;  %v683_v61 = vadd.f32 1e-08, %v1446_v20 }
  0xfd   : > { %1068 = vpow2.f32 %v359_v29  ;;  %v375_v60 = vadd.f32 %v373_v52, %v369_v55  ;;  %v387_v56 = vadd.f32 %v1059_v59, %v385_v53 }
  0xfe   : > { %v722_v15 = vsub.f32 2.0, %v720_v63  ;;  %vm691_vm7 = vcmp.eq.f32.partialorder %v682_v44, inf  ;;  %vm693_vm8 = vcmp.eq.f32.partialorder %v682_v44, 0.0  ;;  %vm703_vm9 = vcmp.eq.f32.partialorder %v683_v61, inf }
  0xff   : > { %v381_v1 = vadd.f32 %v379_v62, %v375_v60  ;;  %1070 = vrcp.f32 %v387_v56  ;;  %vm705_vm11 = vcmp.eq.f32.partialorder %v683_v61, 0.0 }
 0x100   : > { %v1063_v5 = vpop.eup %1062  ;;  %1072 = vrcp.f32 %v717_v0  ;;  %v724_v3 = vmul.f32 %v1061_v57, %v722_v15 }
 0x101   : > { %v1065_v6 = vpop.eup %1064  ;;  %v364_v12 = vmul.f32 %v1063_v5, %v362_v36 }
 0x102   : > { %v1067_v13 = vpop.eup %1066  ;;  %v384_v14 = vadd.f32 %v1065_v6, %v1063_v5  ;;  %v368_v16 = vmul.f32 %v1065_v6, %v366_v37  ;;  %v726_v37 = vmul.f32 30.0, %v724_v3 }
 0x103   : > { %v1069_v28 = vpop.eup %1068  ;;  %v374_v21 = vmul.f32 %v1067_v13, %v372_v8 }
 0x104   : > { %v386_v58 = vadd.f32 %v1067_v13, %v384_v14  ;;  %v370_v19 = vadd.f32 %v368_v16, %v364_v12  ;;  %v380_v32 = vmul.f32 %v1069_v28, %v378_v17  ;;  %v694_v12 = vand.u32 2147483648, %v682_v44 }
 0x105   : > { %v1071_v54 = vpop.eup %1070  ;;  %v709_v16 = vstv %s1485_s6 }
 0x106   : > { %v388_v46 = vadd.f32 %v1069_v28, %v386_v58  ;;  %v392_v33 = vmul.f32 %v1071_v54, %v387_v56  ;;  %v376_v22 = vadd.f32 %v374_v21, %v370_v19  ;;  %v1073_v23 = vpop.eup %1072 }
 0x107   : > { %v721_v31 = vmul.f32 %v1073_v23, %v717_v0 }
 0x108   : > { %1074 = vrcp.f32 %v388_v46  ;;  %v394_v24 = vsub.f32 2.0, %v392_v33  ;;  %v382_v26 = vadd.f32 %v380_v32, %v376_v22 }
 0x109   : > { %v723_v30 = vsub.f32 2.0, %v721_v31  ;;  %1076 = vrsqrt.f32 %v682_v44 }
 0x10a   : > { %v396_v27 = vmul.f32 %v1071_v54, %v394_v24  ;;  %v535_v47 = vpop.permute.xlu2 %534  ;;  %1078 = vrsqrt.f32 %v683_v61  ;;  %v713_v54 = vstv %s1487_s7  ;;  %v706_v24 = vand.u32 2147483648, %v683_v61 }
 0x10b   : > { %v725_v41 = vmul.f32 %v1073_v23, %v723_v30  ;;  %v538_v59 = vmul.f32 %v1335_v51, %v535_v47 }
 0x10c   : > { %v398_v25 = vmul.f32 %v396_v27, %v381_v1 }
 0x10d   : > { %v727_v11 = vmul.f32 30.0, %v725_v41  ;;  %v540_v52 = vsel %vm221_vm2, %v538_v59, 0.0 }
 0x10e   : > { %v1075_v35 = vpop.eup %1074  ;;  %v401_v36 = vadd.f32 %v400_v9, %v398_v25 }
 0x10f   : > { %v393_v39 = vmul.f32 %v1075_v35, %v388_v46  ;;  %v1077_v34 = vpop.eup %1076 }
 0x110   : > { %v728_v10 = vmul.f32 %v726_v37, %v401_v36  ;;  %v685_v38 = vmul.f32 %v1077_v34, %v682_v44  ;;  %v1079_v45 = vpop.eup %1078 }
 0x111   : > { %v395_v40 = vsub.f32 2.0, %v393_v39  ;;  %v697_v62 = vmul.f32 %v1079_v45, %v683_v61 }
 0x112   : > { %v686_v18 = vmul.f32 %v1077_v34, %v685_v38 }
 0x113   : > { %v397_v8 = vmul.f32 %v1075_v35, %v395_v40  ;;  %v698_v20 = vmul.f32 %v1079_v45, %v697_v62 }
 0x114   : > { %v687_v55 = vmul.f32 0.5, %v686_v18 }
 0x115   : > { %v399_v42 = vmul.f32 %v397_v8, %v382_v26  ;;  %v699_v51 = vmul.f32 0.5, %v698_v20 }
 0x116   : > { %v688_v60 = vsub.f32 1.5, %v687_v55 }
 0x117   : > { %v402_v4 = vadd.f32 %v400_v9, %v399_v42  ;;  %v700_v63 = vsub.f32 1.5, %v699_v51 }
 0x118   : > { %v689_v0 = vmul.f32 %v1077_v34, %v688_v60 }
 0x119   : > { %v729_v43 = vmul.f32 %v727_v11, %v402_v4  ;;  %v701_v28 = vmul.f32 %v1079_v45, %v700_v63 }
 0x11b   : > { %v702_v46 = vmul.f32 %v701_v28, %v683_v61 }
 0x11d   : > { %v704_v23 = vsel %vm703_vm9, %v683_v61, %v702_v46 }
 0x11e   : > { %v707_v3 = vsel %vm705_vm11, %v706_v24, %v704_v23 }
 0x11f   : > { %v711_v9 = vmul.f32 %v709_v16, %v707_v3 }
 0x121   : > { %v715_v36 = vadd.f32 %v713_v54, %v711_v9 }
 0x126   : > { %v530_v50 = vpop.permute.xlu1 %529 }
 0x127   : > { %v537_v29 = vmul.f32 %v1331_v49, %v530_v50  ;;  %v690_v49 = vmul.f32 %v689_v0, %v682_v44 }
 0x129   : > { %v539_v17 = vsel %vm221_vm2, %v537_v29, 0.0  ;;  %v692_v6 = vsel %vm691_vm7, %v682_v44, %v690_v49 }
 0x12a   : > { %v541_v53 = vadd.f32 %v540_v52, %v539_v17  ;;  %v695_v14 = vsel %vm693_vm8, %v694_v12, %v692_v6 }
 0x12b   : > { %v710_v19 = vmul.f32 %v709_v16, %v695_v14 }
 0x12c   : > { %v542_v57 = vrot.slane %v541_v53, 4 }
 0x12d   : > { %v714_v22 = vadd.f32 %v713_v54, %v710_v19 }
 0x12e   : > { %v543_v56 = vadd.f32 %v542_v57, %v541_v53 }
 0x130   : > { %v544_v1 = vrot.slane %v543_v56, 2 }
 0x132   : > { %v545_v5 = vadd.f32 %v544_v1, %v543_v56 }
 0x134   : > { %v546_v13 = vrot.slane %v545_v5, 1 }
 0x136   : > { %v547_v58 = vadd.f32 %v546_v13, %v545_v5 }
 0x147   : > { %v551_v21 = vpop.permute.xlu0 %550 }
 0x148   : > { %v558_v15 = vadd.f32 %v551_v21, %v547_v58 }
 0x14a   : > { %v730_v33 = vmul.f32 %v728_v10, %v558_v15 }
 0x14c   : > { %v732_v32 = vmul.f32 %v730_v33, %v714_v22 }
 0x14e   : > { %v736_v26 = vsel %vm734_vm10, -inf, %v732_v32 }
 0x14f   : > { %v738_v27 = vsel %vm221_vm2, %v736_v26, -inf }
 0x150   : > { %739 = vmax.xlane.f32.xlu2 %v738_v27 }
 0x152   : > { %v556_v31 = vpop.permute.xlu1 %555 }
 0x153   : > { %v559_v25 = vadd.f32 %v556_v31, %v547_v58 }
 0x155   : > { %v731_v35 = vmul.f32 %v729_v43, %v559_v25 }
 0x157   : > { %v733_v37 = vmul.f32 %v731_v35, %v715_v36 }
 0x159   : > { %v737_v30 = vsel %vm735_vm12, -inf, %v733_v37 }
 0x15a   : > { %v741_v39 = vsel %vm221_vm2, %v737_v30, -inf }
 0x15b   : > { %742 = vmax.xlane.f32.xlu1 %v741_v39 }
 0x1c3   : > { %v740_v2 = vpop.xlane.xlu2 %739 }
 0x1c4   : > { %v744_v10 = vsub.f32 %v736_v26, %v740_v2 }
 0x1c6   : > { %v746_v40 = vmul.f32 1.442695, %v744_v10 }
 0x1c8   : > { %1080 = vpow2.f32 %v746_v40 }
 0x1ce   : > { %v1081_v41 = vpop.eup %1080  ;;  %v743_v8 = vpop.xlane.xlu1 %742 }
 0x1cf   : > { %v750_v42 = vsel %vm221_vm2, %v1081_v41, 0.0  ;;  %v745_v11 = vsub.f32 %v737_v30, %v743_v8 }
 0x1d0   : > { %751 = vadd.xlane.f32.xlu0 %v750_v42 }
 0x1d1   : > { %v748_v4 = vmul.f32 1.442695, %v745_v11 }
 0x1d3   : > { %1082 = vpow2.f32 %v748_v4 }
 0x1d9   : > { %v1083_v43 = vpop.eup %1082 }
 0x1da   : > { %v753_v7 = vsel %vm221_vm2, %v1083_v43, 0.0 }
 0x1db   : > { %754 = vadd.xlane.f32.xlu2 %v753_v7 }
 0x243   : > { %v752_v44 = vpop.xlane.xlu0 %751 }
 0x244   : > { %1084 = vrcp.f32 %v752_v44 }
 0x24a   : > { %v1085_v34 = vpop.eup %1084 }
 0x24b   : > { %v758_v47 = vmul.f32 %v1085_v34, %v752_v44 }
 0x24d   : > { %v760_v50 = vsub.f32 2.0, %v758_v47 }
 0x24e   : > { %v755_v29 = vpop.xlane.xlu2 %754 }
 0x24f   : > { %v762_v61 = vmul.f32 %v1085_v34, %v760_v50  ;;  %1086 = vrcp.f32 %v755_v29 }
 0x251   : > { %v764_v38 = vmul.f32 %v1081_v41, %v762_v61 }
 0x253   : > { %vm768_vm13 = vcmp.ne.f32.partialorder %v764_v38, 0.0  ;;  %766 = vst.msk [vmem:[%s178_s10] sm:$0xff] %vm221_vm2, %v764_v38 }
 0x254   : > { %v770_v59 = vsel %vm768_vm13, 1.0, %v1181_v48 }
 0x255   : > { %v772_v17 = vsel %vm221_vm2, %v770_v59, 0.0  ;;  %v1087_v18 = vpop.eup %1086 }
 0x256   : > { %773 = vadd.xlane.f32.xlu2 %v772_v17  ;;  %v759_v52 = vmul.f32 %v1087_v18, %v755_v29 }
 0x258   : > { %v761_v53 = vsub.f32 2.0, %v759_v52 }
 0x25a   : > { %v763_v55 = vmul.f32 %v1087_v18, %v761_v53 }
 0x25c   : > { %v765_v45 = vmul.f32 %v1083_v43, %v763_v55 }
 0x25e   : > { %vm769_vm14 = vcmp.ne.f32.partialorder %v765_v45, 0.0  ;;  %767 = vst.msk [vmem:[%s178_s10 + $0x8] sm:$0xff] %vm221_vm2, %v765_v45 }
 0x25f   : > { %v771_v57 = vsel %vm769_vm14, 1.0, %v1181_v48 }
 0x260   : > { %v775_v60 = vsel %vm221_vm2, %v771_v57, 0.0 }
 0x261   : > { %776 = vadd.xlane.f32.xlu1 %v775_v60 }
 0x262   : > { %1130 = shalt.err (!%p1127_p8)
}
 0x263   : > { %s1183_s8 = smov 128   ;;  %s1184_s9 = smov 8   ;;  %vm782_vm0 = vcmask 7168  }
 0x264   : > { %974 = dma.vmem_to_hbm [thread:$0]  (%p1243_p5), %s804_s24, 256, %s806_s25, %s786_s26, %s1183_s8, %s1183_s8, %s1184_s9  }
 0x265   : > { %s195_s17 = scalar_lea.vmem %s1543_s3, %s957_s30 }
 0x2c9   : > { %v774_v48 = vpop.xlane.xlu2 %773 }
 0x2ca   : > { %vm960_vm15 = vcmp.lt.s32.totalorder %v774_v48, 0  ;;  %v961_v62 = vceil.f32 %v774_v48  ;;  %v962_v56 = vfloor.f32 %v774_v48 }
 0x2cc   : > { %v963_v0 = vsel %vm960_vm15, %v961_v62, %v962_v56 }
 0x2cd   : > { %v964_v20 = vcvt.f32.s32 %v963_v0 }
 0x2cf   : > { %v950_v1 = vadd.s32 4294967295, %v964_v20 }
 0x2d1   : > { %783 = vst.msk [vmem:[%s195_s17] sm:$0xff] %vm782_vm0, %v950_v1 }
 0x2d4   : > { %v777_v49 = vpop.xlane.xlu1 %776 }
 0x2d5   : > { %vm965_vm1 = vcmp.lt.s32.totalorder %v777_v49, 0  ;;  %v966_v51 = vceil.f32 %v777_v49  ;;  %v967_v5 = vfloor.f32 %v777_v49 }
 0x2d7   : > { %v968_v6 = vsel %vm965_vm1, %v966_v51, %v967_v5 }
 0x2d8   : > { %v969_v63 = vcvt.f32.s32 %v968_v6 }
 0x2da   : > { %v951_v12 = vadd.s32 4294967295, %v969_v63 }
 0x2dc   : > { %784 = vst.msk [vmem:[%s195_s17 + $0x8] sm:$0xff] %vm782_vm0, %v951_v12 }
 0x2dd PF: > { %p986_p5 = scmp.ge.s32.totalorder %s1169_s15, 2  ;;  %s823_s22 = sand.u32 1, %s1157_s12  }
 0x2de   : > { %s824_s29 = scalar_lea.sflag [#allocation3], %s823_s22 }
 0x2df   : > { %p981_p9 = pnand %p986_p5, %p1247_p6 }
 0x2e1   : > { %p982_p10 = pneg %p981_p9 }
 0x2e3   : > { %1152 = dma.done.wait (%p982_p10), %s824_s29, 256  }
 0x2e4   : > { %1154 = vsyncadd (%p982_p10), %s824_s29, 4294967040  ;;  %p15_p11 = scmp.ge.s32.totalorder %s1230_s18, 4   ;;  %s1546_s12 = smov %s1161_s13 }
 0x2e5   : > { %s1547_s13 = smov %s1165_s14  ;;  %s1548_s14 = smov %s1241_s21 }
 0x2e6   : > { %s1549_s15 = smov %s1230_s18  ;;  %17 = sbr.rel (!%p15_p11) target bundleno = 4 (0x4), region = 80 }
 0x2eb   :  { %838 = vsyncpa [#allocation3], 1 }
 0x2ec   :  { %840 = vsyncpa [#allocation3 + $0x1], 1 }
 0x2ed   :  { %841 = vsyncpa [#allocation4], 1 }
 0x2ee   :  { %843 = vsyncpa [#allocation4 + $0x1], 1 }

</bundles_post_ra>
